<compile_context>
chip_gen: v6e
topology: v6e:2x2x1
jax: 0.10.0
libtpu: 0.0.40
codegen_flags: <defaults>
</compile_context>

<pallas_src>
import jax
import jax.numpy as jnp
from jax.experimental import pallas as pl
from jax.experimental.pallas import tpu as pltpu

ANNOTATORS = 10
CLASSES = 10
_CLAMP = -75.0  # exp(-75) ~ 2.7e-33 >> f32 denormal floor -> group sums stay > 0.


def _round_up(x, m):
    return ((x + m - 1) // m) * m


def full_expertise_kernel(x_ref, w_ref, b_ref, v_ref, s_ref, r_ref, g_ref,
                          result_ref, out_ref):
    """One batch tile.

    x_ref:      [TB, D]     f32   features
    w_ref:      [D, A*C]    f32   fused annotator weights (lane-dense)
    b_ref:      [1, A*C]    f32   fused biases
    v_ref:      [TB, A]     f32   per-annotator weights
    s_ref:      [A*C, A]    f32   indicator: lane e -> annotator e//C   (group sum)
    r_ref:      [A, A*C]    f32   indicator transpose                    (group bcast)
    g_ref:      [A*C, C]    f32   indicator: lane e -> class e%C         (class sum)
    result_ref: [TB, C]     f32   sum_a softmax(out)[:, a, :] * v[:, a, None]
    out_ref:    [TB, A*C]   f32   raw logits (reshaped to [B, A, C] outside)
    """
    x = x_ref[...]                                   # [TB, D]
    v = v_ref[...]                                   # [TB, A]

    # Dropout(p=0) is the identity, so x is used directly.
    # Single fused MXU matmul over all annotators (N = A*C = 100 lanes).
    logits = jnp.dot(x, w_ref[...], preferred_element_type=jnp.float32) \
        + b_ref[...]                                 # [TB, A*C]

    # Lane-dense single store of the raw (pre-softmax) logits.
    out_ref[...] = logits

    # Vectorized segmented softmax over the class axis of every annotator.
    m = jnp.max(logits, axis=-1, keepdims=True)      # [TB, 1]  row-wise stabilizer
    z = jnp.maximum(logits - m, _CLAMP)              # clamp -> no zero group sums
    e = jnp.exp(z)                                   # [TB, A*C]  (EUP)

    # Per-annotator sums of exp (segmented reduction) via tiny MXU matmul.
    s = jnp.dot(e, s_ref[...], preferred_element_type=jnp.float32)   # [TB, A]
    u = v * pl.reciprocal(s, approx=False)                           # [TB, A]
    # Broadcast v_a / s_a back to the A*C lanes of its annotator group.
    ub = jnp.dot(u, r_ref[...], preferred_element_type=jnp.float32)  # [TB, A*C]
    # Class-wise reduction over annotators: result[b, c] = sum_a e*u at lane a*C+c.
    result_ref[...] = jnp.dot(e * ub, g_ref[...],
                              preferred_element_type=jnp.float32)    # [TB, C]


def full_expertise_forward(x, v, w, b, *, max_block_b=1024,
                           vmem_x_budget=8 * 1024 * 1024):
    """Wrapper: fuse weights, build indicator matrices, tile the batch.

    x: [B, D]   v: [B, A]   w: [A, D, C] (PyTorch Linear weight, transposed)
    b: [A, C]
    Returns (result [B, C], out [B, A, C]) matching the PyTorch forward.
    """
    B, D = x.shape
    A, _, C = w.shape
    assert A == ANNOTATORS and C == CLASSES and v.shape == (B, A)
    AC = A * C

    x = x.astype(jnp.float32)
    v = v.astype(jnp.float32)

    # Fused parameter layout: W_fused[d, a*C + c] = w[a, d, c]
    w_fused = jnp.transpose(w, (1, 0, 2)).reshape(D, AC).astype(jnp.float32)
    b_flat = b.reshape(1, AC).astype(jnp.float32)

    # 0/1 indicator matrices (VMEM-resident, ~4 KB each).
    lane = jnp.arange(AC)
    s_mat = (lane[:, None] // C == jnp.arange(A)[None, :]).astype(jnp.float32)
    r_mat = s_mat.T
    g_mat = (lane[:, None] % C == jnp.arange(C)[None, :]).astype(jnp.float32)

    # Batch tile: multiple of 8 (sublane), VMEM-budget aware (double-buffered x).
    tb_cap = max(8, (vmem_x_budget // (2 * max(D, 1) * 4)) // 8 * 8)
    tb = min(max_block_b, _round_up(B, 8), tb_cap)
    Bp = _round_up(B, tb)
    if Bp != B:
        x = jnp.pad(x, ((0, Bp - B), (0, 0)))
        v = jnp.pad(v, ((0, Bp - B), (0, 0)))
    grid = (Bp // tb,)

    result, out_flat = pl.pallas_call(
        full_expertise_kernel,
        out_shape=(
            jax.ShapeDtypeStruct((Bp, C), jnp.float32),    # result
            jax.ShapeDtypeStruct((Bp, AC), jnp.float32),   # logits, lane-dense
        ),
        grid=grid,
        in_specs=[
            pl.BlockSpec((tb, D), lambda i: (i, 0)),       # x: tiled over batch
            pl.BlockSpec((D, AC), lambda i: (0, 0)),       # fused W: resident
            pl.BlockSpec((1, AC), lambda i: (0, 0)),       # fused bias: resident
            pl.BlockSpec((tb, A), lambda i: (i, 0)),       # v: tiled over batch
            pl.BlockSpec((AC, A), lambda i: (0, 0)),       # group-sum indicator
            pl.BlockSpec((A, AC), lambda i: (0, 0)),       # group-bcast indicator
            pl.BlockSpec((AC, C), lambda i: (0, 0)),       # class-sum indicator
        ],
        out_specs=(
            pl.BlockSpec((tb, C), lambda i: (i, 0)),
            pl.BlockSpec((tb, AC), lambda i: (i, 0)),
        ),
        compiler_params=pltpu.CompilerParams(
            dimension_semantics=("parallel",),             # megacore on v7x
        ),
    )(x, w_fused, b_flat, v, s_mat, r_mat, g_mat)

    # Free contiguous reshape to the PyTorch stacking order [B, A, C].
    result = result[:B]
    out = out_flat[:B].reshape(B, A, C)
    return result, out


def reference_forward(x, v, w, b):
    """Pure-JAX reference mirroring the PyTorch forward."""
    logits = jnp.einsum('bd,adc->bac', x, w) + b[None, :, :]   # [B, A, C]
    p = jax.nn.softmax(logits, axis=2)
    result = jnp.sum(p * v[:, :, None], axis=1)                # [B, C]
    return result, logits


if __name__ == "__main__":
    B, D = 32, 32          # small batch / feature dim
    A, C = ANNOTATORS, CLASSES

    key = jax.random.PRNGKey(0)
    kx, kv, kw, kb = jax.random.split(key, 4)

    x = jax.random.normal(kx, (B, D), jnp.float32)
    v = jax.random.uniform(kv, (B, A), jnp.float32)

    # Deterministic parameter init mimicking nn.Linear's U(-1/sqrt(dim), 1/sqrt(dim))
    bound = 1.0 / (D ** 0.5)
    w = jax.random.uniform(kw, (A, D, C), jnp.float32, -bound, bound)
    b = jax.random.uniform(kb, (A, C), jnp.float32, -bound, bound)

    result, out = full_expertise_forward(x, v, w, b)
    jax.block_until_ready((result, out))

    ref_result, ref_out = reference_forward(x, v, w, b)
    assert result.shape == (B, C) and out.shape == (B, A, C)
    assert jnp.allclose(out, ref_out, atol=1e-5, rtol=1e-5)
    assert jnp.allclose(result, ref_result, atol=1e-5, rtol=1e-5)

    # TODO(synk): nn.Dropout with p > 0 (training mode) is not implemented; the
    # module default p=0 makes it the identity, which is what the kernel does.
    print("KERNEL_OK")
</pallas_src>

<mosaic_0001>
module attributes {stable_mosaic.version = 11 : i64} {
  func.func @full_expertise_kernel(%arg0: i32, %arg1: memref<32x32xf32, #tpu.memory_space<vmem>>, %arg2: memref<32x100xf32, #tpu.memory_space<vmem>>, %arg3: memref<1x100xf32, #tpu.memory_space<vmem>>, %arg4: memref<32x10xf32, #tpu.memory_space<vmem>>, %arg5: memref<100x10xf32, #tpu.memory_space<vmem>>, %arg6: memref<10x100xf32, #tpu.memory_space<vmem>>, %arg7: memref<100x10xf32, #tpu.memory_space<vmem>>, %arg8: memref<32x10xf32, #tpu.memory_space<vmem>>, %arg9: memref<32x100xf32, #tpu.memory_space<vmem>>) attributes {dimension_semantics = [#tpu.dimension_semantics<parallel>], iteration_bounds = array<i64: 1>, scalar_prefetch = 0 : i64, scratch_operands = 0 : i64, tpu.core_type = #tpu.core_type<tc>, window_params = [{transform_indices = @transform_0, window_bounds = array<i64: 32, 32>}, {pipeline_mode = #tpu.pipeline_mode<synchronous>, transform_indices = @transform_1, window_bounds = array<i64: 32, 100>}, {pipeline_mode = #tpu.pipeline_mode<synchronous>, transform_indices = @transform_2, window_bounds = array<i64: 1, 100>}, {transform_indices = @transform_3, window_bounds = array<i64: 32, 10>}, {pipeline_mode = #tpu.pipeline_mode<synchronous>, transform_indices = @transform_4, window_bounds = array<i64: 100, 10>}, {pipeline_mode = #tpu.pipeline_mode<synchronous>, transform_indices = @transform_5, window_bounds = array<i64: 10, 100>}, {pipeline_mode = #tpu.pipeline_mode<synchronous>, transform_indices = @transform_6, window_bounds = array<i64: 100, 10>}, {transform_indices = @transform_7, window_bounds = array<i64: 32, 10>}, {transform_indices = @transform_8, window_bounds = array<i64: 32, 100>}]} {
    %c0 = arith.constant 0 : index
    %c0_0 = arith.constant 0 : index
    %0 = vector.load %arg1[%c0, %c0_0] : memref<32x32xf32, #tpu.memory_space<vmem>>, vector<32x32xf32>
    %c0_1 = arith.constant 0 : index
    %c0_2 = arith.constant 0 : index
    %1 = vector.load %arg4[%c0_1, %c0_2] : memref<32x10xf32, #tpu.memory_space<vmem>>, vector<32x10xf32>
    %c0_3 = arith.constant 0 : index
    %c0_4 = arith.constant 0 : index
    %2 = vector.load %arg2[%c0_3, %c0_4] : memref<32x100xf32, #tpu.memory_space<vmem>>, vector<32x100xf32>
    %cst = arith.constant dense<0.000000e+00> : vector<32x100xf32>
    %3 = tpu.matmul %0, %2, %cst {dimension_numbers = #tpu.dot_dimension_numbers<[1], [0], [0], [1], [0, 0, 1, 1], [], []>} : vector<32x32xf32>, vector<32x100xf32>, vector<32x100xf32> -> vector<32x100xf32>
    %c0_5 = arith.constant 0 : index
    %c0_6 = arith.constant 0 : index
    %4 = vector.load %arg3[%c0_5, %c0_6] : memref<1x100xf32, #tpu.memory_space<vmem>>, vector<1x100xf32>
    %5 = vector.broadcast %4 : vector<1x100xf32> to vector<32x100xf32>
    %6 = arith.addf %3, %5 : vector<32x100xf32>
    %c0_7 = arith.constant 0 : index
    %c0_8 = arith.constant 0 : index
    %7 = vector.load %arg9[%c0_7, %c0_8] : memref<32x100xf32, #tpu.memory_space<vmem>>, vector<32x100xf32>
    tpu.vector_store %arg9[%c0_7, %c0_8], %6 {strides = array<i32>} : memref<32x100xf32, #tpu.memory_space<vmem>>, vector<32x100xf32>,
    %cst_9 = arith.constant dense<0xFF800000> : vector<32xf32>
    %8 = vector.multi_reduction <maximumf>, %6, %cst_9 [1] : vector<32x100xf32> to vector<32xf32>
    %9 = vector.shape_cast %8 : vector<32xf32> to vector<32x1xf32>
    %10 = vector.broadcast %9 : vector<32x1xf32> to vector<32x100xf32>
    %11 = arith.subf %6, %10 : vector<32x100xf32>
    %cst_10 = arith.constant -7.500000e+01 : f32
    %12 = vector.broadcast %cst_10 : f32 to vector<32x100xf32>
    %13 = arith.maximumf %11, %12 : vector<32x100xf32>
    %14 = math.exp %13 : vector<32x100xf32>
    %c0_11 = arith.constant 0 : index
    %c0_12 = arith.constant 0 : index
    %15 = vector.load %arg5[%c0_11, %c0_12] : memref<100x10xf32, #tpu.memory_space<vmem>>, vector<100x10xf32>
    %cst_13 = arith.constant dense<0.000000e+00> : vector<32x10xf32>
    %16 = tpu.matmul %14, %15, %cst_13 {dimension_numbers = #tpu.dot_dimension_numbers<[1], [0], [0], [1], [0, 0, 1, 1], [], []>} : vector<32x100xf32>, vector<100x10xf32>, vector<32x10xf32> -> vector<32x10xf32>
    %17 = tpu.reciprocal %16 : vector<32x10xf32> -> vector<32x10xf32>
    %18 = arith.mulf %1, %17 : vector<32x10xf32>
    %c0_14 = arith.constant 0 : index
    %c0_15 = arith.constant 0 : index
    %19 = vector.load %arg6[%c0_14, %c0_15] : memref<10x100xf32, #tpu.memory_space<vmem>>, vector<10x100xf32>
    %cst_16 = arith.constant dense<0.000000e+00> : vector<32x100xf32>
    %20 = tpu.matmul %18, %19, %cst_16 {dimension_numbers = #tpu.dot_dimension_numbers<[1], [0], [0], [1], [0, 0, 1, 1], [], []>} : vector<32x10xf32>, vector<10x100xf32>, vector<32x100xf32> -> vector<32x100xf32>
    %21 = arith.mulf %14, %20 : vector<32x100xf32>
    %c0_17 = arith.constant 0 : index
    %c0_18 = arith.constant 0 : index
    %22 = vector.load %arg7[%c0_17, %c0_18] : memref<100x10xf32, #tpu.memory_space<vmem>>, vector<100x10xf32>
    %cst_19 = arith.constant dense<0.000000e+00> : vector<32x10xf32>
    %23 = tpu.matmul %21, %22, %cst_19 {dimension_numbers = #tpu.dot_dimension_numbers<[1], [0], [0], [1], [0, 0, 1, 1], [], []>} : vector<32x100xf32>, vector<100x10xf32>, vector<32x10xf32> -> vector<32x10xf32>
    %c0_20 = arith.constant 0 : index
    %c0_21 = arith.constant 0 : index
    %24 = vector.load %arg8[%c0_20, %c0_21] : memref<32x10xf32, #tpu.memory_space<vmem>>, vector<32x10xf32>
    tpu.vector_store %arg8[%c0_20, %c0_21], %23 {strides = array<i32>} : memref<32x10xf32, #tpu.memory_space<vmem>>, vector<32x10xf32>,
    return
  }
  func.func @transform_0(%arg0: i32) -> (i32, i32) {
    %c0_i32 = arith.constant 0 : i32
    %c0_i32_0 = arith.constant 0 : i32
    return %arg0, %c0_i32 : i32, i32
  }
  func.func @transform_1(%arg0: i32) -> (i32, i32) {
    %c0_i32 = arith.constant 0 : i32
    %c0_i32_0 = arith.constant 0 : i32
    %c0_i32_1 = arith.constant 0 : i32
    return %c0_i32, %c0_i32_0 : i32, i32
  }
  func.func @transform_2(%arg0: i32) -> (i32, i32) {
    %c0_i32 = arith.constant 0 : i32
    %c0_i32_0 = arith.constant 0 : i32
    %c0_i32_1 = arith.constant 0 : i32
    return %c0_i32, %c0_i32_0 : i32, i32
  }
  func.func @transform_3(%arg0: i32) -> (i32, i32) {
    %c0_i32 = arith.constant 0 : i32
    %c0_i32_0 = arith.constant 0 : i32
    return %arg0, %c0_i32 : i32, i32
  }
  func.func @transform_4(%arg0: i32) -> (i32, i32) {
    %c0_i32 = arith.constant 0 : i32
    %c0_i32_0 = arith.constant 0 : i32
    %c0_i32_1 = arith.constant 0 : i32
    return %c0_i32, %c0_i32_0 : i32, i32
  }
  func.func @transform_5(%arg0: i32) -> (i32, i32) {
    %c0_i32 = arith.constant 0 : i32
    %c0_i32_0 = arith.constant 0 : i32
    %c0_i32_1 = arith.constant 0 : i32
    return %c0_i32, %c0_i32_0 : i32, i32
  }
  func.func @transform_6(%arg0: i32) -> (i32, i32) {
    %c0_i32 = arith.constant 0 : i32
    %c0_i32_0 = arith.constant 0 : i32
    %c0_i32_1 = arith.constant 0 : i32
    return %c0_i32, %c0_i32_0 : i32, i32
  }
  func.func @transform_7(%arg0: i32) -> (i32, i32) {
    %c0_i32 = arith.constant 0 : i32
    %c0_i32_0 = arith.constant 0 : i32
    return %arg0, %c0_i32 : i32, i32
  }
  func.func @transform_8(%arg0: i32) -> (i32, i32) {
    %c0_i32 = arith.constant 0 : i32
    %c0_i32_0 = arith.constant 0 : i32
    return %arg0, %c0_i32 : i32, i32
  }
}

</mosaic_0001>

<bundles_post_ra>
// kernel: tpu_custom_call.1
= control target key start
LH: loop header
LB: loop body
LE: loop exit
PB: predicated region body
PF: predicated region fallthrough
CT: control target
= control target key end

     0   :  { %vm48_vm0 = vcmask 261120   ;;  %s987_s0 = inlined_call_operand.vmem [shape: f32[32,32], index: 0, kind: input, shape index: {}]   ;;  %s988_s1 = inlined_call_operand.vmem [shape: f32[32,100], index: 1, kind: input, shape index: {}]   ;;  %s989_s2 = inlined_call_operand.vmem [shape: f32[1,100], index: 2, kind: input, shape index: {}]   ;;  %s990_s3 = inlined_call_operand.vmem [shape: f32[32,10], index: 3, kind: input, shape index: {}]   ;;  %s991_s4 = inlined_call_operand.vmem [shape: f32[100,10], index: 4, kind: input, shape index: {}]   ;;  %s992_s5 = inlined_call_operand.vmem [shape: f32[10,100], index: 5, kind: input, shape index: {}]   ;;  %s993_s6 = inlined_call_operand.vmem [shape: f32[100,10], index: 6, kind: input, shape index: {}]   ;;  %s994_s7 = inlined_call_operand.vmem [shape: f32[32,10], index: 7, kind: output, shape index: {0}]   ;;  %s995_s8 = inlined_call_operand.hbm [shape: f32[32,100], index: 8, kind: output, shape index: {1}]  }
   0x1   :  { %v40_v0 = vld [vmem:[%s988_s1 + $0x18] sm:$0xff]  ;;  %v39_v1 = vld [vmem:[%s988_s1 + $0x10] sm:$0xff]  ;;  %v29_v2 = vld [vmem:[%s987_s0] sm:$0xff] }
   0x2   :  { %614 = vmatprep.subr.mxu1 %v40_v0  ;;  %v38_v3 = vld [vmem:[%s988_s1 + $0x8] sm:$0xff]  ;;  %622 = vmatprep.mubr.msk.f32.mxu1 %vm48_vm0, %v29_v2 }
   0x3   :  { %615 = vmatpush3.msra.mxu1 %v40_v0 }
   0x4   :  { %14 = vsyncpa [#allocation3], 0  ;;  %616 = vmatprep.subr.mxu1 %v39_v1  ;;  %v37_v4 = vld [vmem:[%s988_s1] sm:$0xff]  ;;  %v30_v5 = vld [vmem:[%s987_s0 + $0x8] sm:$0xff]  ;;  %vm204_vm1 = vcmask 1043456   ;;  %vm146_vm2 = vcmask 818176  }
   0x5   :  { %617 = vmatpush3.msra.mxu1 %v39_v1  ;;  %v31_v6 = vld [vmem:[%s987_s0 + $0x10] sm:$0xff]  ;;  %v32_v7 = vld [vmem:[%s987_s0 + $0x18] sm:$0xff]  ;;  %v191_v8 = vld [vmem:[%s991_s4 + $0x60] sm:$0xf]  ;;  %vm316_vm3 = vcmask 1041408   ;;  %vm303_vm4 = vcmask 80896  }
   0x6   :  { %618 = vmatprep.subr.mxu1 %v38_v3  ;;  %v546_v9 = vld [vmem:[%s989_s2] ss:$0 sm:$0xff]  ;;  %v190_v22 = vld [vmem:[%s991_s4 + $0x58] sm:$0xff]  ;;  %v189_v23 = vld [vmem:[%s991_s4 + $0x50] sm:$0xff] }
   0x7   :  { %619 = vmatpush3.msra.mxu1 %v38_v3  ;;  %v188_v24 = vld [vmem:[%s991_s4 + $0x48] sm:$0xff]  ;;  %v187_v25 = vld [vmem:[%s991_s4 + $0x40] sm:$0xff]  ;;  %v186_v26 = vld [vmem:[%s991_s4 + $0x38] sm:$0xff] }
   0x8   :  { %620 = vmatprep.subr.mxu1 %v37_v4  ;;  %v185_v27 = vld [vmem:[%s991_s4 + $0x30] sm:$0xff]  ;;  %v184_v28 = vld [vmem:[%s991_s4 + $0x28] sm:$0xff]  ;;  %v183_v29 = vld [vmem:[%s991_s4 + $0x20] sm:$0xff] }
   0x9   :  { %621 = vmatpush3.msra.mxu1 %v37_v4  ;;  %v182_v30 = vld [vmem:[%s991_s4 + $0x18] sm:$0xff]  ;;  %v181_v31 = vld [vmem:[%s991_s4 + $0x10] sm:$0xff]  ;;  %v180_v32 = vld [vmem:[%s991_s4 + $0x8] sm:$0xff] }
   0xa   :  { %623 = vmatmul.mubr.msk.f32.vlgmr.msra.gmra.mxu1 %vm48_vm0, %v30_v5  ;;  %628 = vmatprep.subr.msk.mxu1 %vm204_vm1, %v191_v8  ;;  %v179_v33 = vld [vmem:[%s991_s4] sm:$0xff]  ;;  %v302_v54 = vld [vmem:[%s992_s5 + $0x8] sm:$0x3]  ;;  %v35_v3 = vld [vmem:[%s990_s3 + $0x10] sm:$0xff] }
   0xb   :  { %625 = vmatprep.mubr.msk.f32.mxu1 %vm48_vm0, %v31_v6  ;;  %629 = vmatpush3.msk.msra.mxu1 %vm204_vm1, %v191_v8  ;;  %v301_v55 = vld [vmem:[%s992_s5] sm:$0xff]  ;;  %v34_v63 = vld [vmem:[%s990_s3 + $0x8] sm:$0xff]  ;;  %v36_v5 = vld [vmem:[%s990_s3 + $0x18] sm:$0xff] }
   0xc   :  { %630 = vmatprep.subr.mxu1 %v190_v22  ;;  %660 = vmatprep.subr.msk.mxu0 %vm316_vm3, %v302_v54  ;;  %v421_v56 = vld [vmem:[%s993_s6 + $0x60] sm:$0xf]  ;;  %v420_v6 = vld [vmem:[%s993_s6 + $0x58] sm:$0xff] }
   0xd   :  { %631 = vmatpush3.msra.mxu1 %v190_v22  ;;  %661 = vmatpush3.msk.msra.mxu0 %vm316_vm3, %v302_v54  ;;  %v33_v61 = vld [vmem:[%s990_s3] sm:$0xff] }
   0xe   :  { %626 = vmatmul.mubr.msk.f32.gmra.mxu1 %vm48_vm0, %v32_v7  ;;  %632 = vmatprep.subr.mxu1 %v189_v23 }
   0xf   :  { %633 = vmatpush3.msra.mxu1 %v189_v23  ;;  %662 = vmatprep.subr.mxu0 %v301_v55 }
  0x10   :  { %634 = vmatprep.subr.mxu1 %v188_v24  ;;  %663 = vmatpush3.msra.mxu0 %v301_v55 }
  0x11   :  { %635 = vmatpush3.msra.mxu1 %v188_v24  ;;  %670 = vmatprep.subr.msk.mxu0 %vm204_vm1, %v421_v56 }
  0x12   :  { %636 = vmatprep.subr.mxu1 %v187_v25 }
  0x13   :  { %637 = vmatpush3.msra.mxu1 %v187_v25 }
  0x14   :  { %638 = vmatprep.subr.mxu1 %v186_v26 }
  0x15   :  { %639 = vmatpush3.msra.mxu1 %v186_v26 }
  0x16   :  { %640 = vmatprep.subr.mxu1 %v185_v27 }
  0x17   :  { %641 = vmatpush3.msra.mxu1 %v185_v27 }
  0x18   :  { %642 = vmatprep.subr.mxu1 %v184_v28 }
  0x19   :  { %643 = vmatpush3.msra.mxu1 %v184_v28 }
  0x1a   :  { %644 = vmatprep.subr.mxu1 %v183_v29 }
  0x1b   :  { %645 = vmatpush3.msra.mxu1 %v183_v29 }
  0x1c   :  { %646 = vmatprep.subr.mxu1 %v182_v30 }
  0x1d   :  { %647 = vmatpush3.msra.mxu1 %v182_v30 }
  0x1e   :  { %648 = vmatprep.subr.mxu1 %v181_v31 }
  0x1f   :  { %649 = vmatpush3.msra.mxu1 %v181_v31 }
  0x20   :  { %650 = vmatprep.subr.mxu1 %v180_v32 }
  0x21   :  { %651 = vmatpush3.msra.mxu1 %v180_v32 }
  0x22   :  { %652 = vmatprep.subr.mxu1 %v179_v33 }
  0x23   :  { %653 = vmatpush3.msra.mxu1 %v179_v33 }
  0xca   :  { %v624_v10 = vpop.f32.mrf.mxu1 }
  0xcb   :  { %v827_v11 = vadd.f32 %v624_v10, %v546_v9 }
  0xcc   :  { %v127_v12 = vpop.f32.mrf.mxu1 }
  0xcd   :  { %148 = vst.msk [vmem:[#allocation2 + $0x8] sm:$0xff] %vm146_vm2, %v827_v11  ;;  %v128_v13 = vadd.f32 %v546_v9, %v127_v12  ;;  %v154_v20 = vsel %vm146_vm2, %v827_v11, -inf  ;;  %v417_v12 = vld [vmem:[%s993_s6 + $0x40] sm:$0xff] }
  0xce   :  { %v627_v14 = vpop.f32.mrf.mxu1 }
  0xcf   :  { %147 = vst.msk [vmem:[#allocation2] sm:$0xff] %vm146_vm2, %v128_v13  ;;  %v832_v15 = vadd.f32 %v627_v14, %v546_v9  ;;  %v151_v16 = vsel %vm146_vm2, %v128_v13, -inf  ;;  %v415_v14 = vld [vmem:[%s993_s6 + $0x30] sm:$0xff] }
  0xd0   :  { %v137_v17 = vpop.f32.mrf.mxu1  ;;  %152 = vmax.xlane.f32.xlu0 %v151_v16  ;;  %v413_v16 = vld [vmem:[%s993_s6 + $0x20] sm:$0xff] }
  0xd1   :  { %150 = vst.msk [vmem:[#allocation2 + $0x18] sm:$0xff] %vm146_vm2, %v832_v15  ;;  %v138_v18 = vadd.f32 %v546_v9, %v137_v17  ;;  %v160_v21 = vsel %vm146_vm2, %v832_v15, -inf  ;;  %v419_v9 = vld [vmem:[%s993_s6 + $0x50] sm:$0xff]  ;;  %v412_v17 = vld [vmem:[%s993_s6 + $0x18] sm:$0xff] }
  0xd3   :  { %149 = vst.msk [vmem:[#allocation2 + $0x10] sm:$0xff] %vm146_vm2, %v138_v18  ;;  %v157_v19 = vsel %vm146_vm2, %v138_v18, -inf }
  0xd4   :  { %158 = vmax.xlane.f32.xlu1 %v157_v19  ;;  %155 = vmax.xlane.f32.xlu0 %v154_v20  ;;  %v410_v19 = vld [vmem:[%s993_s6 + $0x8] sm:$0xff]  ;;  %v409_v20 = vld [vmem:[%s993_s6] sm:$0xff] }
  0xd8   :  { %161 = vmax.xlane.f32.xlu1 %v160_v21 }
 0x159   :  { %v153_v34 = vpop.xlane.xlu0 %152 }
 0x15a   :  { %v163_v35 = vsub.f32 %v128_v13, %v153_v34  ;;  %v416_v13 = vld [vmem:[%s993_s6 + $0x38] sm:$0xff] }
 0x15c   :  { %v167_v36 = vmax.f32 %v163_v35, -75.0 }
 0x15d   :  { %v159_v37 = vpop.xlane.xlu1 %158  ;;  %v156_v38 = vpop.xlane.xlu0 %155 }
 0x15e   :  { %v171_v39 = vmul.f32 1.442695, %v167_v36  ;;  %v165_v40 = vsub.f32 %v138_v18, %v159_v37  ;;  %v164_v41 = vsub.f32 %v827_v11, %v156_v38  ;;  %v418_v11 = vld [vmem:[%s993_s6 + $0x48] sm:$0xff]  ;;  %v411_v18 = vld [vmem:[%s993_s6 + $0x10] sm:$0xff] }
 0x160   :  { %705 = vpow2.f32 %v171_v39  ;;  %v169_v42 = vmax.f32 %v165_v40, -75.0  ;;  %v168_v43 = vmax.f32 %v164_v41, -75.0 }
 0x161   :  { %v162_v44 = vpop.xlane.xlu1 %161 }
 0x162   :  { %v175_v45 = vmul.f32 1.442695, %v169_v42  ;;  %v173_v46 = vmul.f32 1.442695, %v168_v43  ;;  %v166_v47 = vsub.f32 %v832_v15, %v162_v44  ;;  %v414_v15 = vld [vmem:[%s993_s6 + $0x28] sm:$0xff]  ;;  %s743_s6 = smov [#allocation2]  }
 0x163   :  { %s533_s29 = sshll.u32 %s743_s6, 4  ;;  %s534_s29 = int_to_ptr.vmem [resolvable:$true] %s533_s29 }
 0x164   :  { %707 = vpow2.f32 %v175_v45  ;;  %v170_v48 = vmax.f32 %v166_v47, -75.0  ;;  %s721_s30 = scalar_lea.vmem %s534_s29, 512  ;;  %p726_p1 = scmp.lt.s32.totalorder %s534_s29, %s534_s29 }
 0x165   :  { %709 = vpow2.f32 %v173_v46  ;;  %p722_p0 = scmp.ne.s32.totalorder %s534_s29, %s721_s30  ;;  %p727_p2 = scmp.lt.s32.totalorder %s721_s30, %s721_s30 }
 0x166   :  { %v177_v49 = vmul.f32 1.442695, %v170_v48 }
 0x167   :  { %p728_p3 = por %p727_p2, %p726_p1 }
 0x168   :  { %711 = vpow2.f32 %v177_v49 }
 0x169   :  { %p729_p4 = pnand %p728_p3, %p722_p0 }
 0x16d   :  { %v881_v50 = vpop.eup %705 }
 0x16e   :  { %654 = vmatprep.mubr.msk.f32.mxu1 %vm146_vm2, %v881_v50 }
 0x171   :  { %v885_v51 = vpop.eup %707 }
 0x172   :  { %v887_v52 = vpop.eup %709 }
 0x173   :  { %655 = vmatmul.mubr.msk.f32.vlgmr.msra.gmra.mxu1 %vm146_vm2, %v887_v52 }
 0x174   :  { %657 = vmatprep.mubr.msk.f32.mxu1 %vm146_vm2, %v885_v51 }
 0x175   :  { %v893_v53 = vpop.eup %711 }
 0x177   :  { %658 = vmatmul.mubr.msk.f32.gmra.mxu1 %vm146_vm2, %v893_v53 }
 0x233   :  { %v656_v57 = vpop.f32.mrf.mxu1 }
 0x234   :  { %713 = vrcp.f32 %v656_v57 }
 0x235   :  { %v274_v58 = vpop.f32.mrf.mxu1 }
 0x236   :  { %715 = vrcp.f32 %v274_v58 }
 0x237   :  { %v659_v59 = vpop.f32.mrf.mxu1 }
 0x238   :  { %717 = vrcp.f32 %v659_v59 }
 0x239   :  { %v284_v60 = vpop.f32.mrf.mxu1 }
 0x23a   :  { %719 = vrcp.f32 %v284_v60 }
 0x241   :  { %v714_v62 = vpop.eup %713 }
 0x242   :  { %v298_v2 = vmul.f32 %v714_v62, %v34_v63 }
 0x243   :  { %v716_v0 = vpop.eup %715 }
 0x244   :  { %v297_v1 = vmul.f32 %v716_v0, %v33_v61 }
 0x245   :  { %v718_v4 = vpop.eup %717 }
 0x246   :  { %664 = vmatprep.mubr.msk.f32.mxu0 %vm303_vm4, %v297_v1  ;;  %v300_v10 = vmul.f32 %v718_v4, %v36_v5 }
 0x247   :  { %v720_v7 = vpop.eup %719  ;;  %665 = vmatmul.mubr.msk.f32.vlgmr.msra.gmra.mxu0 %vm303_vm4, %v298_v2 }
 0x248   :  { %v299_v8 = vmul.f32 %v720_v7, %v35_v3  ;;  %671 = vmatpush3.msk.msra.mxu0 %vm204_vm1, %v421_v56 }
 0x249   :  { %672 = vmatprep.subr.mxu0 %v420_v6 }
 0x24a   :  { %667 = vmatprep.mubr.msk.f32.mxu0 %vm303_vm4, %v299_v8  ;;  %673 = vmatpush3.msra.mxu0 %v420_v6 }
 0x24b   :  { %668 = vmatmul.mubr.msk.f32.gmra.mxu0 %vm303_vm4, %v300_v10  ;;  %674 = vmatprep.subr.mxu0 %v419_v9 }
 0x24c   :  { %675 = vmatpush3.msra.mxu0 %v419_v9 }
 0x24d   :  { %676 = vmatprep.subr.mxu0 %v418_v11 }
 0x24e   :  { %677 = vmatpush3.msra.mxu0 %v418_v11 }
 0x24f   :  { %678 = vmatprep.subr.mxu0 %v417_v12 }
 0x250   :  { %679 = vmatpush3.msra.mxu0 %v417_v12 }
 0x251   :  { %680 = vmatprep.subr.mxu0 %v416_v13 }
 0x252   :  { %681 = vmatpush3.msra.mxu0 %v416_v13 }
 0x253   :  { %682 = vmatprep.subr.mxu0 %v415_v14 }
 0x254   :  { %683 = vmatpush3.msra.mxu0 %v415_v14 }
 0x255   :  { %684 = vmatprep.subr.mxu0 %v414_v15 }
 0x256   :  { %685 = vmatpush3.msra.mxu0 %v414_v15 }
 0x257   :  { %686 = vmatprep.subr.mxu0 %v413_v16 }
 0x258   :  { %687 = vmatpush3.msra.mxu0 %v413_v16 }
 0x259   :  { %688 = vmatprep.subr.mxu0 %v412_v17 }
 0x25a   :  { %689 = vmatpush3.msra.mxu0 %v412_v17 }
 0x25b   :  { %690 = vmatprep.subr.mxu0 %v411_v18 }
 0x25c   :  { %691 = vmatpush3.msra.mxu0 %v411_v18 }
 0x25d   :  { %692 = vmatprep.subr.mxu0 %v410_v19 }
 0x25e   :  { %693 = vmatpush3.msra.mxu0 %v410_v19 }
 0x25f   :  { %694 = vmatprep.subr.mxu0 %v409_v20 }
 0x260   :  { %695 = vmatpush3.msra.mxu0 %v409_v20 }
 0x307   :  { %v666_v21 = vpop.f32.mrf.mxu0 }
 0x308   :  { %v406_v24 = vmul.f32 %v887_v52, %v666_v21 }
 0x309   :  { %v386_v22 = vpop.f32.mrf.mxu0 }
 0x30a   :  { %v405_v23 = vmul.f32 %v881_v50, %v386_v22 }
 0x30b   :  { %v669_v25 = vpop.f32.mrf.mxu0 }
 0x30c   :  { %696 = vmatprep.mubr.msk.f32.mxu0 %vm146_vm2, %v405_v23  ;;  %v408_v28 = vmul.f32 %v893_v53, %v669_v25 }
 0x30d   :  { %v396_v26 = vpop.f32.mrf.mxu0  ;;  %697 = vmatmul.mubr.msk.f32.vlgmr.msra.gmra.mxu0 %vm146_vm2, %v406_v24 }
 0x30e   :  { %v407_v27 = vmul.f32 %v885_v51, %v396_v26 }
 0x310   :  { %699 = vmatprep.mubr.msk.f32.mxu0 %vm146_vm2, %v407_v27 }
 0x311   :  { %700 = vmatmul.mubr.msk.f32.gmra.mxu0 %vm146_vm2, %v408_v28 }
 0x312   :  { %732 = shalt.err (!%p729_p4)
}
 0x313   :  { %s744_s9 = smov 128   ;;  %s745_s10 = smov 8  }
 0x314   :  { %539 = dma.vmem_to_hbm [thread:$0]  %s534_s29, 512, %s995_s8, [#allocation3], %s744_s9, %s744_s9, %s745_s10  }
 0x3cd   :  { %v698_v29 = vpop.f32.mrf.mxu0 }
 0x3ce   :  { %523 = vst.msk [vmem:[%s994_s7 + $0x8] sm:$0xff] %vm303_vm4, %v698_v29 }
 0x3cf   :  { %v503_v30 = vpop.f32.mrf.mxu0 }
 0x3d0   :  { %522 = vst.msk [vmem:[%s994_s7] sm:$0xff] %vm303_vm4, %v503_v30 }
 0x3d1   :  { %v701_v31 = vpop.f32.mrf.mxu0 }
 0x3d2   :  { %525 = vst.msk [vmem:[%s994_s7 + $0x18] sm:$0xff] %vm303_vm4, %v701_v31 }
 0x3d3   :  { %v513_v32 = vpop.f32.mrf.mxu0 }
 0x3d4   :  { %524 = vst.msk [vmem:[%s994_s7 + $0x10] sm:$0xff] %vm303_vm4, %v513_v32 }
 0x3d5   :  { %741 = dma.done.wait [#allocation3], 512  }
 0x3d6   :  { %742 = vsyncadd [#allocation3], 4294966784 }
 0x3d7   :  { %545 = vsyncpa [#allocation3], 1 }

</bundles_post_ra>
